<compile_context>
chip_gen: v6e
topology: v6e:2x2x1
jax: 0.10.0
libtpu: 0.0.40
codegen_flags: <defaults>
</compile_context>

<pallas_src>
import functools
import math

import numpy as np
import jax
import jax.numpy as jnp
from jax.experimental import pallas as pl
from jax.experimental.pallas import tpu as pltpu

WINDOW = 7  # swin_s window size
# full torchvision swin_s.features[0:6] config: (dim, heads, depth) per stage
STAGES = ((96, 3, 2), (192, 6, 2), (384, 12, 18))


def _round_up(x, m):
    return (x + m - 1) // m * m


# -----------------------------------------------------------------------------
# Tiled matmul kernel (bf16 MXU inputs, f32 accumulator, fused bias + LeakyReLU)
# -----------------------------------------------------------------------------
def _mm_kernel(a_ref, b_ref, bias_ref, o_ref, acc_ref, *, act):
    @pl.when(pl.program_id(2) == 0)
    def _():
        acc_ref[...] = jnp.zeros_like(acc_ref)

    acc_ref[...] += jnp.dot(a_ref[...], b_ref[...], preferred_element_type=jnp.float32)

    @pl.when(pl.program_id(2) == pl.num_programs(2) - 1)
    def _():
        r = acc_ref[...] + bias_ref[...]
        if act == "lrelu":                       # fused LeakyReLU(negative_slope=0.1)
            r = jnp.where(r >= 0, r, 0.1 * r)
        o_ref[...] = r.astype(o_ref.dtype)


@functools.lru_cache(maxsize=None)
def _matmul_call(Mp, Kp, Np, tm, tk, tn, act, out_dtype_name):
    out_dtype = jnp.dtype(out_dtype_name)
    grid = (Mp // tm, Np // tn, Kp // tk)
    return pl.pallas_call(
        functools.partial(_mm_kernel, act=act),
        out_shape=jax.ShapeDtypeStruct((Mp, Np), out_dtype),
        grid_spec=pltpu.PrefetchScalarGridSpec(
            num_scalar_prefetch=0,
            grid=grid,
            in_specs=[
                pl.BlockSpec((tm, tk), lambda i, j, k: (i, k)),
                pl.BlockSpec((tk, tn), lambda i, j, k: (k, j)),
                pl.BlockSpec((1, tn), lambda i, j, k: (0, j)),
            ],
            out_specs=pl.BlockSpec((tm, tn), lambda i, j, k: (i, j)),
            scratch_shapes=[pltpu.VMEM((tm, tn), jnp.float32)],
        ),
        compiler_params=pltpu.CompilerParams(
            dimension_semantics=("parallel", "parallel", "arbitrary")),
    )


def _pick_tiles(M, K, N):
    tn = min(512, _round_up(N, 128))
    tk = _round_up(K, 128)
    if tk > 768:                     # big K: iterate; small K: single lane-aligned step (no pad waste)
        tk = 512
    # grow tm when the per-step K*N footprint is small so each grid step carries enough work
    if tk * tn <= 128 * 512:
        tm = 2048
    elif tk * tn <= 640 * 512:
        tm = 1024
    else:
        tm = 512
    tm = min(tm, _round_up(M, 16))
    return tm, tk, tn


def matmul_pallas(a, w, bias=None, act=None, out_dtype=jnp.float32):
    """(M,K) @ (K,N) + bias, optional fused LeakyReLU.  bf16 MXU inputs, f32 accumulate."""
    M, K = a.shape
    K2, N = w.shape
    assert K == K2
    tm, tk, tn = _pick_tiles(M, K, N)
    Mp, Kp, Np = _round_up(M, tm), _round_up(K, tk), _round_up(N, tn)

    a_p = a if a.dtype == jnp.bfloat16 else a.astype(jnp.bfloat16)
    w_p = w if w.dtype == jnp.bfloat16 else w.astype(jnp.bfloat16)
    if (Mp, Kp) != (M, K):
        a_p = jnp.pad(a_p, ((0, Mp - M), (0, Kp - K)))
    if (Kp, Np) != (K, N):
        w_p = jnp.pad(w_p, ((0, Kp - K), (0, Np - N)))
    b = jnp.zeros((N,), jnp.float32) if bias is None else bias.astype(jnp.float32)
    b_p = (jnp.pad(b, (0, Np - N)) if Np != N else b).reshape(1, Np)

    out = _matmul_call(Mp, Kp, Np, tm, tk, tn, act, jnp.dtype(out_dtype).name)(a_p, w_p, b_p)
    if (Mp, Np) != (M, N):
        out = out[:M, :N]
    return out


# -----------------------------------------------------------------------------
# Fused bilinear interpolation kernel (W-resize then H-resize, both lane-dense)
# -----------------------------------------------------------------------------
def _resize_kernel(x_ref, mh_ref, mwT_ref, o_ref):
    mh = mh_ref[...]             # (oh, h) f32
    mwT = mwT_ref[...]           # (w, ow) f32
    for c in range(x_ref.shape[0]):
        t = jnp.dot(x_ref[c].astype(jnp.float32), mwT,
                    preferred_element_type=jnp.float32)                    # (h, ow) lane-dense
        o_ref[c] = jnp.dot(mh, t, preferred_element_type=jnp.float32).astype(o_ref.dtype)


@functools.lru_cache(maxsize=None)
def _resize_call(BCp, blk, h, w, oh, ow, out_dtype_name):
    out_dtype = jnp.dtype(out_dtype_name)
    return pl.pallas_call(
        _resize_kernel,
        out_shape=jax.ShapeDtypeStruct((BCp, oh, ow), out_dtype),
        grid=(BCp // blk,),
        in_specs=[
            pl.BlockSpec((blk, h, w), lambda i: (i, 0, 0)),
            pl.BlockSpec((oh, h), lambda i: (0, 0)),
            pl.BlockSpec((w, ow), lambda i: (0, 0)),
        ],
        out_specs=pl.BlockSpec((blk, oh, ow), lambda i: (i, 0, 0)),
        compiler_params=pltpu.CompilerParams(dimension_semantics=("parallel",)),
    )


@functools.lru_cache(maxsize=None)
def _bilinear_matrix(out_size, in_size):
    """F.interpolate(mode='bilinear', align_corners=False) resampling matrix."""
    i = np.arange(out_size, dtype=np.float64)
    src = np.clip((i + 0.5) * (in_size / out_size) - 0.5, 0.0, in_size - 1.0)
    i0 = np.floor(src).astype(np.int64)
    i1 = np.minimum(i0 + 1, in_size - 1)
    frac = src - i0
    m = np.zeros((out_size, in_size), np.float32)
    m[np.arange(out_size), i0] += (1.0 - frac)
    m[np.arange(out_size), i1] += frac
    return jnp.asarray(m)


def bilinear_resize_planes(x, oh, ow, out_dtype=jnp.float32):
    """x: (B, C, h, w) -> (B, C, oh, ow); both resampling matmuls fused in one kernel."""
    B, C, h, w = x.shape
    BC = B * C
    mh = _bilinear_matrix(oh, h)
    mwT = _bilinear_matrix(ow, w).T
    blk = max(1, min(16, (4 << 20) // max(1, oh * ow * 4)))
    blk = min(blk, BC)
    BCp = _round_up(BC, blk)
    xp = x.reshape(BC, h, w)
    if BCp != BC:
        xp = jnp.pad(xp, ((0, BCp - BC), (0, 0), (0, 0)))
    y = _resize_call(BCp, blk, h, w, oh, ow, jnp.dtype(out_dtype).name)(xp, mh, mwT)
    return y[:BC].reshape(B, C, oh, ow)


def resize_nhwc(x, oh, ow, out_dtype=jnp.float32):
    y = bilinear_resize_planes(jnp.transpose(x, (0, 3, 1, 2)), oh, ow, out_dtype)
    return jnp.transpose(y, (0, 2, 3, 1))


# -----------------------------------------------------------------------------
# Temporal mean/max reduction kernel (tiled over lane-aligned D chunks)
# -----------------------------------------------------------------------------
def _meanmax_kernel(x_ref, mean_ref, max_ref):
    x = x_ref[...].astype(jnp.float32)          # (B, T, dblk)
    mean_ref[...] = jnp.mean(x, axis=1).astype(mean_ref.dtype)
    max_ref[...] = jnp.max(x, axis=1).astype(max_ref.dtype)


@functools.lru_cache(maxsize=None)
def _meanmax_call(B, T, D, dblk, out_dtype_name):
    out_dtype = jnp.dtype(out_dtype_name)
    return pl.pallas_call(
        _meanmax_kernel,
        out_shape=(jax.ShapeDtypeStruct((B, D), out_dtype),
                   jax.ShapeDtypeStruct((B, D), out_dtype)),
        grid=(D // dblk,),
        in_specs=[pl.BlockSpec((B, T, dblk), lambda i: (0, 0, i))],
        out_specs=(pl.BlockSpec((B, dblk), lambda i: (0, i)),
                   pl.BlockSpec((B, dblk), lambda i: (0, i))),
        compiler_params=pltpu.CompilerParams(dimension_semantics=("parallel",)),
    )


def mean_max_time(s, out_dtype=jnp.bfloat16):
    """s: (B, T, H, W, C) channels-last -> (mean over T, max over T), each (B, H, W, C)."""
    B, T, H, W, C = s.shape
    D = H * W * C
    x = s.reshape(B, T, D)
    if D % 128 == 0:
        d128 = D // 128
        g = max(1, D // (128 * 128))            # target ~16K lanes per chunk
        while d128 % g:
            g += 1
        dblk = D // g
    else:
        dblk = D
    mean, mx = _meanmax_call(B, T, D, dblk, jnp.dtype(out_dtype).name)(x)
    return mean.reshape(B, H, W, C), mx.reshape(B, H, W, C)


# -----------------------------------------------------------------------------
# Fused window-attention kernel: QK^T + rel-bias (+ shift-mask) + softmax + PV
# Processes WB windows x all heads per grid step; bf16 in/out, f32 accumulation.
# -----------------------------------------------------------------------------
def _wattn_body(qkv_ref, bias_ref, mask_ref, o_ref, scale):
    _, WB, heads, L, hd = qkv_ref.shape
    q = qkv_ref[0].reshape(WB * heads, L, hd)
    k = qkv_ref[1].reshape(WB * heads, L, hd)
    v = qkv_ref[2].reshape(WB * heads, L, hd)
    s = jnp.einsum("bld,bmd->blm", q, k, preferred_element_type=jnp.float32) * scale
    s = s.reshape(WB, heads, L, L) + bias_ref[...][None]
    if mask_ref is not None:
        s = s + mask_ref[...][:, None]
    s = s - jnp.max(s, axis=-1, keepdims=True)
    e = jnp.exp(s)
    p = e * pl.reciprocal(jnp.sum(e, axis=-1, keepdims=True), approx=True)
    p = p.reshape(WB * heads, L, L).astype(q.dtype)
    o = jnp.einsum("blm,bmd->bld", p, v, preferred_element_type=jnp.float32)
    o_ref[...] = o.reshape(WB, heads, L, hd).astype(o_ref.dtype)


def _wattn_plain_kernel(qkv_ref, bias_ref, o_ref, *, scale):
    _wattn_body(qkv_ref, bias_ref, None, o_ref, scale)


def _wattn_masked_kernel(qkv_ref, bias_ref, mask_ref, o_ref, *, scale):
    _wattn_body(qkv_ref, bias_ref, mask_ref, o_ref, scale)


@functools.lru_cache(maxsize=None)
def _wattn_call(Bn, WB, heads, L, hd, scale, nwin_mask):
    """nwin_mask == 0 -> mask-less kernel; otherwise windows-per-image for mask indexing."""
    grid = (Bn // WB,)
    qkv_spec = pl.BlockSpec((3, WB, heads, L, hd), lambda b: (0, b, 0, 0, 0))
    bias_spec = pl.BlockSpec((heads, L, L), lambda b: (0, 0, 0))
    out_spec = pl.BlockSpec((WB, heads, L, hd), lambda b: (b, 0, 0, 0))
    out_shape = jax.ShapeDtypeStruct((Bn, heads, L, hd), jnp.bfloat16)
    if nwin_mask:
        nblk = nwin_mask // WB
        in_specs = [qkv_spec, bias_spec,
                    pl.BlockSpec((WB, L, L), lambda b: (b % nblk, 0, 0))]
        kern = functools.partial(_wattn_masked_kernel, scale=scale)
    else:
        in_specs = [qkv_spec, bias_spec]
        kern = functools.partial(_wattn_plain_kernel, scale=scale)
    return pl.pallas_call(
        kern, out_shape=out_shape, grid=grid,
        in_specs=in_specs, out_specs=out_spec,
        compiler_params=pltpu.CompilerParams(dimension_semantics=("parallel",)),
    )


def _pick_wb(nwin, heads):
    """Largest divisor of windows-per-image, bounded so blocks stay small (WB*heads<=96)."""
    best = 1
    for d in range(1, nwin + 1):
        if nwin % d == 0 and d <= 32 and d * heads <= 96:
            best = d
    return best


# -----------------------------------------------------------------------------
# Convolutions (NHWC im2col glue in JAX in bf16, matmul in Pallas)
# -----------------------------------------------------------------------------
def conv2d(x, w, b, ksize=1, stride=1, padding=0, act=None, out_dtype=jnp.bfloat16):
    """x: NHWC; w: (kh*kw*Cin, Cout) bf16 with (kh, kw, Cin) K-ordering.  Returns NHWC."""
    if x.dtype != jnp.bfloat16:
        x = x.astype(jnp.bfloat16)
    B, H, W, C = x.shape
    kh = kw = ksize
    Cout = w.shape[1]
    if padding:
        x = jnp.pad(x, ((0, 0), (padding, padding), (padding, padding), (0, 0)))
        H += 2 * padding
        W += 2 * padding
    Ho = (H - kh) // stride + 1
    Wo = (W - kw) // stride + 1
    if kh == 1 and kw == 1 and stride == 1:
        cols = x.reshape(B * H * W, C)
    elif stride == kh and kh == kw and padding == 0 and H % kh == 0 and W % kw == 0:
        # non-overlapping patches (patch-embed): single reshape/transpose instead of kh*kw slices
        cols = x.reshape(B, Ho, kh, Wo, kw, C).transpose(0, 1, 3, 2, 4, 5)
        cols = cols.reshape(B * Ho * Wo, kh * kw * C)
    else:
        # TODO(synk): implicit-GEMM conv (fold kh*kw taps into the matmul K grid axis via shifted
        # BlockSpec index_maps) would avoid materializing the im2col buffer entirely; bf16 halves it.
        taps = [x[:, dh:dh + Ho * stride:stride, dw:dw + Wo * stride:stride, :]
                for dh in range(kh) for dw in range(kw)]
        cols = jnp.concatenate(taps, axis=-1).reshape(B * Ho * Wo, kh * kw * C)
    y = matmul_pallas(cols, w, b, act, out_dtype=out_dtype)
    return y.reshape(B, Ho, Wo, Cout)


def conv3d(x, w, b, k, stride, act=None, out_dtype=jnp.bfloat16):
    """x: (B, T, H, W, C) channels-last; w: (kt*kh*kw*Cin, Cout) bf16.  Valid padding."""
    if x.dtype != jnp.bfloat16:
        x = x.astype(jnp.bfloat16)
    B, T, H, W, C = x.shape
    kt, kh, kw = k
    st, sh, sw = stride
    Cout = w.shape[1]
    To = (T - kt) // st + 1
    Ho = (H - kh) // sh + 1
    Wo = (W - kw) // sw + 1
    taps = [x[:, dt:dt + To * st:st, dh:dh + Ho * sh:sh, dw:dw + Wo * sw:sw, :]
            for dt in range(kt) for dh in range(kh) for dw in range(kw)]
    cols = jnp.concatenate(taps, axis=-1).reshape(B * To * Ho * Wo, kt * kh * kw * C)
    y = matmul_pallas(cols, w, b, act, out_dtype=out_dtype)
    return y.reshape(B, To, Ho, Wo, Cout)


# -----------------------------------------------------------------------------
# Swin backbone (torchvision swin_s.features[0:6]) — NHWC throughout
# -----------------------------------------------------------------------------
_coords = np.stack(np.meshgrid(np.arange(WINDOW), np.arange(WINDOW), indexing="ij"), -1).reshape(-1, 2)
_rel = _coords[:, None] - _coords[None, :] + WINDOW - 1
REL_IDX = jnp.asarray(_rel[..., 0] * (2 * WINDOW - 1) + _rel[..., 1])       # (49, 49)


def layernorm(x, g, b, eps=1e-5, out_dtype=None):
    x = x.astype(jnp.float32)
    m = jnp.mean(x, axis=-1, keepdims=True)
    v = jnp.mean(jnp.square(x - m), axis=-1, keepdims=True)
    y = (x - m) * jax.lax.rsqrt(v + eps) * g + b
    return y if out_dtype is None else y.astype(out_dtype)


@functools.lru_cache(maxsize=None)
def _shift_mask(hp, wp, window, shift):
    m = np.zeros((hp, wp), np.int32)
    cnt = 0
    for h0, h1 in ((0, hp - window), (hp - window, hp - shift), (hp - shift, hp)):
        for w0, w1 in ((0, wp - window), (wp - window, wp - shift), (wp - shift, wp)):
            m[h0:h1, w0:w1] = cnt
            cnt += 1
    mw = m.reshape(hp // window, window, wp // window, window).transpose(0, 2, 1, 3)
    mw = mw.reshape(-1, window * window)
    return jnp.asarray(np.where(mw[:, :, None] != mw[:, None, :], -100.0, 0.0).astype(np.float32))


def window_attention(x, bp, heads, shift):
    B, H, W, C = x.shape                                 # x is bf16 (layernorm output)
    win = WINDOW
    pad_b, pad_r = (-H) % win, (-W) % win
    xp = jnp.pad(x, ((0, 0), (0, pad_b), (0, pad_r), (0, 0))) if (pad_b or pad_r) else x
    Hp, Wp = H + pad_b, W + pad_r
    # torchvision disables shifting per-dim; feature maps here are square so one flag suffices.
    if Hp == win or Wp == win:
        shift = 0
    if shift > 0:
        xp = jnp.roll(xp, shift=(-shift, -shift), axis=(1, 2))
    nh, nw = Hp // win, Wp // win
    nwin = nh * nw
    L = win * win
    hd = C // heads
    xw = xp.reshape(B, nh, win, nw, win, C).transpose(0, 1, 3, 2, 4, 5).reshape(B * nwin * L, C)
    Bn = B * nwin

    qkv = matmul_pallas(xw, bp["qkv_w"], bp["qkv_b"], out_dtype=jnp.bfloat16)
    qkv = jnp.transpose(qkv.reshape(Bn, L, 3, heads, hd), (2, 0, 3, 1, 4))   # (3, Bn, heads, L, hd)

    WB = _pick_wb(nwin, heads)
    scale = float(hd) ** -0.5
    if shift > 0:
        mask = _shift_mask(Hp, Wp, win, shift)                               # (nwin, L, L)
        out = _wattn_call(Bn, WB, heads, L, hd, scale, nwin)(qkv, bp["attn_bias"], mask)
    else:
        out = _wattn_call(Bn, WB, heads, L, hd, scale, 0)(qkv, bp["attn_bias"])

    out = jnp.transpose(out, (0, 2, 1, 3)).reshape(Bn * L, C)                # bf16
    out = matmul_pallas(out, bp["proj_w"], bp["proj_b"], out_dtype=jnp.bfloat16)
    out = out.reshape(B, nh, nw, win, win, C).transpose(0, 1, 3, 2, 4, 5).reshape(B, Hp, Wp, C)
    if shift > 0:
        out = jnp.roll(out, shift=(shift, shift), axis=(1, 2))
    return out[:, :H, :W, :]


def swin_block(x, bp, heads, shift):
    # dropout / stochastic depth are identity at inference; residual stream stays f32.
    B, H, W, C = x.shape
    h = layernorm(x, bp["ln1_g"], bp["ln1_b"], out_dtype=jnp.bfloat16)
    x = x + window_attention(h, bp, heads, shift)
    h = layernorm(x, bp["ln2_g"], bp["ln2_b"], out_dtype=jnp.bfloat16)
    h = matmul_pallas(h.reshape(-1, C), bp["fc1_w"], bp["fc1_b"], out_dtype=jnp.bfloat16)
    # TODO(synk): fusing exact (erf) GELU into the matmul epilogue would remove this HBM roundtrip.
    h = jax.nn.gelu(h.astype(jnp.float32), approximate=False).astype(jnp.bfloat16)
    h = matmul_pallas(h, bp["fc2_w"], bp["fc2_b"], out_dtype=jnp.bfloat16)
    return x + h.reshape(B, H, W, C)


def patch_merge(x, pp):
    x0, x1 = x[:, 0::2, 0::2], x[:, 1::2, 0::2]
    x2, x3 = x[:, 0::2, 1::2], x[:, 1::2, 1::2]
    x = jnp.concatenate([x0, x1, x2, x3], axis=-1)
    x = layernorm(x, pp["ln_g"], pp["ln_b"], out_dtype=jnp.bfloat16)
    B, H2, W2, C4 = x.shape
    y = matmul_pallas(x.reshape(-1, C4), pp["red_w"], out_dtype=jnp.float32)
    return y.reshape(B, H2, W2, C4 // 2)


def swin_backbone(p, x):
    # vit[0]: Conv2d(6,96,4,4) patch embed (Pallas matmul) + LayerNorm, NHWC already.
    h = conv2d(x, p["pe_w"], p["pe_b"], ksize=4, stride=4, out_dtype=jnp.float32)
    h = layernorm(h, p["pe_ln_g"], p["pe_ln_b"])
    hr = None
    for si, (dim, heads, depth) in enumerate(p["stages_cfg"]):
        if si > 0:
            h = patch_merge(h, p["patch_merge"][si - 1])
        for bi in range(depth):
            h = swin_block(h, p["stages"][si][bi], heads, 0 if bi % 2 == 0 else WINDOW // 2)
        if si == 0:
            hr = h                                   # vit[0:2](x)
    return hr, h                                     # NHWC: (B,IMG/4,IMG/4,96), (B,IMG/16,IMG/16,384)


# -----------------------------------------------------------------------------
# MyNet4 forward
# -----------------------------------------------------------------------------
def forward_rgb(p, x):
    B, _, img, _ = x.shape
    xm = jnp.zeros((B, 1, img, img), x.dtype)
    x = (x / 255.0 - 0.5) / 0.25
    x = jnp.concatenate([x, xm], axis=1)             # (B, 6, img, img) NCHW
    x = jnp.transpose(x, (0, 2, 3, 1))               # NHWC once, stays NHWC everywhere
    hr, xf = swin_backbone(p, x)
    plow = conv2d(xf, p["classiflow_w"], p["classiflow_b"], ksize=1, out_dtype=jnp.float32)
    plow = bilinear_resize_planes(jnp.transpose(plow, (0, 3, 1, 2)), img, img)   # NCHW output
    return plow, xf, hr


def forward_sentinel(p, s):
    s = jnp.transpose(s, (0, 2, 3, 4, 1))            # (B, T, H, W, C) channels-last
    s = conv3d(s, p["conv1_w"], p["conv1_b"], (2, 1, 1), (2, 1, 1), act="lrelu")
    s = conv3d(s, p["conv2_w"], p["conv2_b"], (2, 1, 1), (2, 1, 1), act="lrelu")
    s = conv3d(s, p["conv3_w"], p["conv3_b"], (3, 3, 3), (1, 1, 1), act="lrelu")
    s = conv3d(s, p["conv4_w"], p["conv4_b"], (2, 1, 1), (2, 1, 1), act="lrelu")
    s_mean, s_max = mean_max_time(s)
    s = jnp.concatenate([s_max, s_mean], axis=-1)    # torch: cat([max, mean], dim=1)
    s = conv2d(s, p["conv5_w"], p["conv5_b"], ksize=3, act="lrelu")
    s = conv2d(s, p["conv6_w"], p["conv6_b"], ksize=3, act="lrelu")
    s = conv2d(s, p["conv7_w"], p["conv7_b"], ksize=3, act="lrelu")
    return s                                         # NHWC bf16 (B, img/16, img/16, 256)


def forward_classifier(p, xf, hr, s):
    B, h4, w4, _ = hr.shape
    xfb = xf.astype(jnp.bfloat16)
    hrb = hr.astype(jnp.bfloat16)
    xs = jnp.concatenate([xfb, s], axis=-1)
    xs = conv2d(xs, p["merge1_w"], p["merge1_b"], act="lrelu")
    xs = jnp.concatenate([xfb, xs], axis=-1)
    xs = conv2d(xs, p["merge2_w"], p["merge2_b"], act="lrelu")
    xs = jnp.concatenate([xfb, xs], axis=-1)
    xs = conv2d(xs, p["merge3_w"], p["merge3_b"], act="lrelu")
    f = resize_nhwc(xs, h4, w4, out_dtype=jnp.bfloat16)
    xi = resize_nhwc(xfb, h4, w4, out_dtype=jnp.bfloat16)
    f = jnp.concatenate([f, xi, hrb], axis=-1)
    f = conv2d(f, p["decod1_w"], p["decod1_b"], act="lrelu")
    f = jnp.concatenate([f, xi, hrb], axis=-1)
    f = conv2d(f, p["decod2_w"], p["decod2_b"], act="lrelu")
    f = jnp.concatenate([f, xi, hrb], axis=-1)
    f = conv2d(f, p["decod3_w"], p["decod3_b"], ksize=3, padding=1, act="lrelu")
    f = jnp.concatenate([f, xi, hrb], axis=-1)
    f = conv2d(f, p["decod4_w"], p["decod4_b"], ksize=3, padding=1, act="lrelu")
    f = jnp.concatenate([f, xi, hrb], axis=-1)
    pc = conv2d(f, p["classif_w"], p["classif_b"], out_dtype=jnp.float32)
    return pc, xs                                    # pc NHWC f32 (B, img/4, img/4, 13)


def forward(p, x, s, mode=1):
    assert 1 <= mode <= 4
    img = x.shape[-1]
    plow, xf, hr = forward_rgb(p, x)
    if mode == 2:
        return plow
    if mode == 1:
        sf = forward_sentinel(p, s)
        pc, _ = forward_classifier(p, xf, hr, sf)
        pc = bilinear_resize_planes(jnp.transpose(pc, (0, 3, 1, 2)), img, img)
        return pc + 0.1 * plow
    # TODO(synk): modes 3/4 (compress/expand/generate reconstruction branch + min-over-timestep loss).
    raise NotImplementedError("mode 3/4 not implemented")


# -----------------------------------------------------------------------------
# Deterministic synthetic parameters (shapes from MyNet4.__init__ / swin_s),
# conv/linear weights pre-transposed + pre-cast to bf16 once at init.
# -----------------------------------------------------------------------------
def _torch_conv_to_kn(w):
    """PyTorch conv weight (Cout, Cin, *k) -> (prod(k)*Cin, Cout), K ordered (*k, Cin)."""
    nd = w.ndim
    perm = tuple(range(2, nd)) + (1, 0)
    return jnp.transpose(w, perm).reshape(-1, w.shape[0])


def init_params(seed=0, stages=STAGES):
    keys = iter(jax.random.split(jax.random.PRNGKey(seed), 4096))

    def rnd(shape, scale):
        return jax.random.normal(next(keys), shape, jnp.float32) * scale

    def linw(fin, fout):
        return rnd((fin, fout), 1.0 / math.sqrt(fin)).astype(jnp.bfloat16)

    def torch_conv(cout, cin, *k):
        fan = cin * int(np.prod(k)) if k else cin
        return rnd((cout, cin) + tuple(int(v) for v in k), 1.0 / math.sqrt(fan))

    p = {"stages_cfg": tuple(stages)}

    # vit[0][0]: Conv2d(6,96,4,4) built as cat([old/2, old/2], dim=1) in __init__
    old = torch_conv(96, 3, 4, 4)
    p["pe_w"] = _torch_conv_to_kn(jnp.concatenate([old * 0.5, old * 0.5], axis=1)).astype(jnp.bfloat16)
    p["pe_b"] = jnp.zeros((96,), jnp.float32)
    p["pe_ln_g"] = jnp.ones((96,), jnp.float32)
    p["pe_ln_b"] = jnp.zeros((96,), jnp.float32)

    p["stages"] = []
    for dim, heads, depth in stages:
        blocks = []
        for _ in range(depth):
            rel = rnd(((2 * WINDOW - 1) ** 2, heads), 0.02)
            blocks.append(dict(
                ln1_g=jnp.ones((dim,), jnp.float32), ln1_b=jnp.zeros((dim,), jnp.float32),
                qkv_w=linw(dim, 3 * dim), qkv_b=jnp.zeros((3 * dim,), jnp.float32),
                proj_w=linw(dim, dim), proj_b=jnp.zeros((dim,), jnp.float32),
                # relative-position bias pre-gathered/transposed once: (heads, 49, 49) f32
                attn_bias=jnp.transpose(rel[REL_IDX], (2, 0, 1)).astype(jnp.float32),
                ln2_g=jnp.ones((dim,), jnp.float32), ln2_b=jnp.zeros((dim,), jnp.float32),
                fc1_w=linw(dim, 4 * dim), fc1_b=jnp.zeros((4 * dim,), jnp.float32),
                fc2_w=linw(4 * dim, dim), fc2_b=jnp.zeros((dim,), jnp.float32),
            ))
        p["stages"].append(blocks)
    p["patch_merge"] = []
    for dim, _, _ in stages[:-1]:
        p["patch_merge"].append(dict(
            ln_g=jnp.ones((4 * dim,), jnp.float32),
            ln_b=jnp.zeros((4 * dim,), jnp.float32),
            red_w=linw(4 * dim, 2 * dim),
        ))

    def conv(name, cout, cin, *k):
        p[name + "_w"] = _torch_conv_to_kn(torch_conv(cout, cin, *k)).astype(jnp.bfloat16)
        p[name + "_b"] = jnp.zeros((cout,), jnp.float32)

    conv("classiflow", 13, 384, 1, 1)
    conv("conv1", 32, 10, 2, 1, 1)
    conv("conv2", 64, 32, 2, 1, 1)
    conv("conv3", 92, 64, 3, 3, 3)
    conv("conv4", 128, 92, 2, 1, 1)
    conv("conv5", 256, 256, 3, 3)
    conv("conv6", 256, 256, 3, 3)
    conv("conv7", 256, 256, 3, 3)
    conv("merge1", 640, 640, 1, 1)
    conv("merge2", 640, 1024, 1, 1)
    conv("merge3", 128, 1024, 1, 1)
    conv("decod1", 128, 608, 1, 1)
    conv("decod2", 128, 608, 1, 1)
    conv("decod3", 128, 608, 3, 3)
    conv("decod4", 128, 608, 3, 3)
    conv("classif", 13, 608, 1, 1)
    # TODO(synk): compress/expand/expand2/generate1-3 only feed modes 3/4 (not implemented here).
    return p


if __name__ == "__main__":
    # Small self-test configuration: same architecture/dataflow, reduced spatial size and Swin
    # depths so the run finishes quickly.  Full-scale model: IMG=512, stages=STAGES,
    # sentinel input (B, 10, 32, 40, 40).
    IMG_DEMO = 64
    DEMO_STAGES = ((96, 3, 2), (192, 6, 1), (384, 12, 2))
    params = init_params(0, stages=DEMO_STAGES)

    key = jax.random.PRNGKey(0)
    kx, ks = jax.random.split(key)
    # aerial input: 5 channels (a zero mask channel is concatenated inside forwardRGB -> 6)
    x = jax.random.uniform(kx, (1, 5, IMG_DEMO, IMG_DEMO), jnp.float32, 0.0, 255.0)
    # sentinel time series: (B, 10 bands, T=32 timesteps, IMG/16 + 8, IMG/16 + 8)
    s = jax.random.normal(ks, (1, 10, 32, IMG_DEMO // 16 + 8, IMG_DEMO // 16 + 8), jnp.float32)

    out = forward(params, x, s, mode=1)
    out = jax.block_until_ready(out)
    assert out.shape == (1, 13, IMG_DEMO, IMG_DEMO), out.shape
    assert bool(jnp.all(jnp.isfinite(out)))
    print("KERNEL_OK")
</pallas_src>

<mosaic_0001>
module attributes {stable_mosaic.version = 11 : i64} {
  func.func @_mm_kernel(%arg0: i32, %arg1: i32, %arg2: i32, %arg3: memref<256x128xbf16, #tpu.memory_space<vmem>>, %arg4: memref<128x128xbf16, #tpu.memory_space<vmem>>, %arg5: memref<1x128xf32, #tpu.memory_space<vmem>>, %arg6: memref<256x128xf32, #tpu.memory_space<vmem>>, %arg7: memref<256x128xf32, #tpu.memory_space<vmem>>) attributes {dimension_semantics = [#tpu.dimension_semantics<parallel>, #tpu.dimension_semantics<parallel>, #tpu.dimension_semantics<arbitrary>], iteration_bounds = array<i64: 1, 1, 1>, scalar_prefetch = 0 : i64, scratch_operands = 1 : i64, tpu.core_type = #tpu.core_type<tc>, window_params = [{transform_indices = @transform_0, window_bounds = array<i64: 256, 128>}, {transform_indices = @transform_1, window_bounds = array<i64: 128, 128>}, {transform_indices = @transform_2, window_bounds = array<i64: 1, 128>}, {transform_indices = @transform_3, window_bounds = array<i64: 256, 128>}]} {
    %c0_i32 = arith.constant 0 : i32
    %0 = arith.cmpi eq, %arg2, %c0_i32 : i32
    %1 = arith.extui %0 : i1 to i32
    %c0_i32_0 = arith.constant 0 : i32
    %2 = arith.cmpi ne, %1, %c0_i32_0 : i32
    scf.if %2 {
      %cst_10 = arith.constant 0.000000e+00 : f32
      %12 = vector.broadcast %cst_10 : f32 to vector<256x128xf32>
      %c0_11 = arith.constant 0 : index
      %c0_12 = arith.constant 0 : index
      %13 = vector.load %arg7[%c0_11, %c0_12] : memref<256x128xf32, #tpu.memory_space<vmem>>, vector<256x128xf32>
      tpu.vector_store %arg7[%c0_11, %c0_12], %12 {strides = array<i32>} : memref<256x128xf32, #tpu.memory_space<vmem>>, vector<256x128xf32>,
    } else {
    }
    %c0 = arith.constant 0 : index
    %c0_1 = arith.constant 0 : index
    %3 = vector.load %arg7[%c0, %c0_1] : memref<256x128xf32, #tpu.memory_space<vmem>>, vector<256x128xf32>
    %c0_2 = arith.constant 0 : index
    %c0_3 = arith.constant 0 : index
    %4 = vector.load %arg3[%c0_2, %c0_3] : memref<256x128xbf16, #tpu.memory_space<vmem>>, vector<256x128xbf16>
    %c0_4 = arith.constant 0 : index
    %c0_5 = arith.constant 0 : index
    %5 = vector.load %arg4[%c0_4, %c0_5] : memref<128x128xbf16, #tpu.memory_space<vmem>>, vector<128x128xbf16>
    %cst = arith.constant dense<0.000000e+00> : vector<256x128xf32>
    %6 = tpu.matmul %4, %5, %cst {dimension_numbers = #tpu.dot_dimension_numbers<[1], [0], [0], [1], [0, 0, 1, 1], [], []>} : vector<256x128xbf16>, vector<128x128xbf16>, vector<256x128xf32> -> vector<256x128xf32>
    %7 = arith.addf %3, %6 : vector<256x128xf32>
    %c0_6 = arith.constant 0 : index
    %c0_7 = arith.constant 0 : index
    %8 = vector.load %arg7[%c0_6, %c0_7] : memref<256x128xf32, #tpu.memory_space<vmem>>, vector<256x128xf32>
    tpu.vector_store %arg7[%c0_6, %c0_7], %7 {strides = array<i32>} : memref<256x128xf32, #tpu.memory_space<vmem>>, vector<256x128xf32>,
    %c0_i32_8 = arith.constant 0 : i32
    %9 = arith.cmpi eq, %arg2, %c0_i32_8 : i32
    %10 = arith.extui %9 : i1 to i32
    %c0_i32_9 = arith.constant 0 : i32
    %11 = arith.cmpi ne, %10, %c0_i32_9 : i32
    scf.if %11 {
      %c0_10 = arith.constant 0 : index
      %c0_11 = arith.constant 0 : index
      %12 = vector.load %arg7[%c0_10, %c0_11] : memref<256x128xf32, #tpu.memory_space<vmem>>, vector<256x128xf32>
      %c0_12 = arith.constant 0 : index
      %c0_13 = arith.constant 0 : index
      %13 = vector.load %arg5[%c0_12, %c0_13] : memref<1x128xf32, #tpu.memory_space<vmem>>, vector<1x128xf32>
      %14 = vector.broadcast %13 : vector<1x128xf32> to vector<256x128xf32>
      %15 = arith.addf %12, %14 : vector<256x128xf32>
      %c0_14 = arith.constant 0 : index
      %c0_15 = arith.constant 0 : index
      %16 = vector.load %arg6[%c0_14, %c0_15] : memref<256x128xf32, #tpu.memory_space<vmem>>, vector<256x128xf32>
      tpu.vector_store %arg6[%c0_14, %c0_15], %15 {strides = array<i32>} : memref<256x128xf32, #tpu.memory_space<vmem>>, vector<256x128xf32>,
    } else {
    }
    return
  }
  func.func @transform_0(%arg0: i32, %arg1: i32, %arg2: i32) -> (i32, i32) {
    %c0_i32 = arith.constant 0 : i32
    return %arg0, %arg2 : i32, i32
  }
  func.func @transform_1(%arg0: i32, %arg1: i32, %arg2: i32) -> (i32, i32) {
    %c0_i32 = arith.constant 0 : i32
    return %arg2, %arg1 : i32, i32
  }
  func.func @transform_2(%arg0: i32, %arg1: i32, %arg2: i32) -> (i32, i32) {
    %c0_i32 = arith.constant 0 : i32
    %c0_i32_0 = arith.constant 0 : i32
    return %c0_i32, %arg1 : i32, i32
  }
  func.func @transform_3(%arg0: i32, %arg1: i32, %arg2: i32) -> (i32, i32) {
    %c0_i32 = arith.constant 0 : i32
    return %arg0, %arg1 : i32, i32
  }
}

</mosaic_0001>

<bundles_post_ra>
// kernel: tpu_custom_call.1
= control target key start
LH: loop header
LB: loop body
LE: loop exit
PB: predicated region body
PF: predicated region fallthrough
CT: control target
= control target key end

     0   :  { %8 = vsyncpa [#allocation4], 0  ;;  %s936_s0 = inlined_call_operand.hbm [shape: bf16[256,128], index: 0, kind: input, shape index: {}]   ;;  %s937_s1 = inlined_call_operand.hbm [shape: bf16[128,128], index: 1, kind: input, shape index: {}]   ;;  %s938_s2 = inlined_call_operand.vmem [shape: f32[1,128], index: 2, kind: input, shape index: {}]   ;;  %s939_s3 = inlined_call_operand.hbm [shape: f32[256,128], index: 3, kind: output, shape index: {}]  }
   0x1   :  { %9 = vsyncpa [#allocation7], 0 }
   0x2   :  { %10 = vsyncpa [#allocation5], 0  ;;  %s863_s12 = smov [#allocation3]  }
   0x3   :  { %s16_s13 = sshll.u32 %s863_s12, 4  ;;  %s17_s13 = int_to_ptr.vmem [resolvable:$true] %s16_s13 }
   0x4   :  { %s805_s14 = scalar_lea.vmem %s17_s13, 2048  ;;  %p810_p1 = scmp.lt.s32.totalorder %s17_s13, %s17_s13 }
   0x5   :  { %p806_p0 = scmp.ne.s32.totalorder %s17_s13, %s805_s14  ;;  %p811_p2 = scmp.lt.s32.totalorder %s805_s14, %s805_s14 }
   0x7   :  { %p812_p3 = por %p811_p2, %p810_p1 }
   0x9   :  { %p813_p4 = pnand %p812_p3, %p806_p0 }
   0xb   :  { %816 = shalt.err (!%p813_p4)
}
   0xc   :  { %s864_s15 = smov 64   ;;  %s865_s16 = smov 4  }
   0xd   :  { %22 = dma.hbm_to_vmem [thread:$0]  %s936_s0, 2048, %s17_s13, [#allocation4], %s864_s15, %s864_s15, %s865_s16  }
   0xe   :  { %s866_s19 = smov [#allocation6]  }
   0xf   :  { %s28_s20 = sshll.u32 %s866_s19, 4  ;;  %s29_s20 = int_to_ptr.vmem [resolvable:$true] %s28_s20 }
  0x10   :  { %s825_s21 = scalar_lea.vmem %s29_s20, 1024  ;;  %p830_p6 = scmp.lt.s32.totalorder %s29_s20, %s29_s20 }
  0x11   :  { %p826_p5 = scmp.ne.s32.totalorder %s29_s20, %s825_s21  ;;  %p831_p7 = scmp.lt.s32.totalorder %s825_s21, %s825_s21 }
  0x13   :  { %p832_p8 = por %p831_p7, %p830_p6 }
  0x15   :  { %p833_p9 = pnand %p832_p8, %p826_p5 }
  0x17   :  { %836 = shalt.err (!%p833_p9)
}
  0x18   :  { %34 = dma.hbm_to_vmem [thread:$0]  %s937_s1, 1024, %s29_s20, [#allocation7], %s864_s15, %s864_s15, %s865_s16  }
  0x19   :  { %857 = dma.done.wait [#allocation4], 2048  }
  0x1a   :  { %858 = vsyncadd [#allocation4], 4294965248 }
  0x1b   :  { %859 = dma.done.wait [#allocation7], 1024  }
  0x1c   :  { %860 = vsyncadd [#allocation7], 4294966272  ;;  %v773_v0 = vld [vmem:[#allocation6 + $0x38] sm:$0xff]   ;;  %v774_v1 = vld [vmem:[#allocation6 + $0x30] sm:$0xff]  }
  0x1d   :  { %702 = vmatprep.subr.bf16.mxu0 %v773_v0  ;;  %750 = vmatprep.subr.bf16.mxu1 %v773_v0  ;;  %v775_v2 = vld [vmem:[#allocation6 + $0x28] sm:$0xff]   ;;  %v776_v3 = vld [vmem:[#allocation6 + $0x20] sm:$0xff]   ;;  %v777_v6 = vld [vmem:[#allocation6 + $0x18] sm:$0xff]  }
  0x1e   :  { %703 = vmatpush3.bf16.msra.mxu0 %v773_v0  ;;  %758 = vmatpush3.bf16.msra.mxu1 %v773_v0  ;;  %v781_v4 = vld [vmem:[#allocation3] sm:$0xff]   ;;  %v778_v7 = vld [vmem:[#allocation6 + $0x10] sm:$0xff]   ;;  %v779_v8 = vld [vmem:[#allocation6 + $0x8] sm:$0xff]  }
  0x1f   :  { %704 = vmatprep.subr.bf16.mxu0 %v774_v1  ;;  %751 = vmatprep.subr.bf16.mxu1 %v774_v1  ;;  %v782_v5 = vld [vmem:[#allocation3 + $0x40] sm:$0xff]   ;;  %v783_v10 = vld [vmem:[#allocation3 + $0x8] sm:$0xff]   ;;  %v785_v12 = vld [vmem:[#allocation3 + $0x10] sm:$0xff]  }
  0x20   :  { %718 = vmatprep.mubr.bf16.mxu0 %v781_v4  ;;  %734 = vmatprep.mubr.bf16.mxu1 %v782_v5  ;;  %v780_v9 = vld [vmem:[#allocation6] sm:$0xff]   ;;  %v784_v11 = vld [vmem:[#allocation3 + $0x48] sm:$0xff]   ;;  %v786_v13 = vld [vmem:[#allocation3 + $0x50] sm:$0xff]  }
  0x21   :  { %v787_v14 = vld [vmem:[#allocation3 + $0x18] sm:$0xff]   ;;  %v789_v16 = vld [vmem:[#allocation3 + $0x20] sm:$0xff]   ;;  %v791_v18 = vld [vmem:[#allocation3 + $0x28] sm:$0xff]  }
  0x22   :  { %705 = vmatpush3.bf16.msra.mxu0 %v774_v1  ;;  %759 = vmatpush3.bf16.msra.mxu1 %v774_v1  ;;  %v788_v15 = vld [vmem:[#allocation3 + $0x58] sm:$0xff]   ;;  %v790_v17 = vld [vmem:[#allocation3 + $0x60] sm:$0xff]   ;;  %v792_v19 = vld [vmem:[#allocation3 + $0x68] sm:$0xff]  }
  0x23   :  { %706 = vmatprep.subr.bf16.mxu0 %v775_v2  ;;  %752 = vmatprep.subr.bf16.mxu1 %v775_v2  ;;  %v793_v20 = vld [vmem:[#allocation3 + $0x30] sm:$0xff]   ;;  %v795_v22 = vld [vmem:[#allocation3 + $0x38] sm:$0xff]   ;;  %v899_v24 = vld [vmem:[%s938_s2] ss:$0 sm:$0xff]  ;;  %s867_s2 = smov [#allocation8]  }
  0x24   :  { %v794_v21 = vld [vmem:[#allocation3 + $0x70] sm:$0xff]   ;;  %v796_v23 = vld [vmem:[#allocation3 + $0x78] sm:$0xff]   ;;  %s640_s24 = sshll.u32 %s867_s2, 4  ;;  %s641_s24 = int_to_ptr.vmem [resolvable:$true] %s640_s24 }
  0x25   :  { %s837_s25 = scalar_lea.vmem %s641_s24, 4096  ;;  %p842_p11 = scmp.lt.s32.totalorder %s641_s24, %s641_s24 }
  0x26   :  { %707 = vmatpush3.bf16.msra.mxu0 %v775_v2  ;;  %760 = vmatpush3.bf16.msra.mxu1 %v775_v2  ;;  %p838_p10 = scmp.ne.s32.totalorder %s641_s24, %s837_s25  ;;  %p843_p12 = scmp.lt.s32.totalorder %s837_s25, %s837_s25 }
  0x27   :  { %708 = vmatprep.subr.bf16.mxu0 %v776_v3  ;;  %753 = vmatprep.subr.bf16.mxu1 %v776_v3 }
  0x28   :  { %p844_p13 = por %p843_p12, %p842_p11 }
  0x2a   :  { %709 = vmatpush3.bf16.msra.mxu0 %v776_v3  ;;  %761 = vmatpush3.bf16.msra.mxu1 %v776_v3  ;;  %p845_p0 = pnand %p844_p13, %p838_p10 }
  0x2b   :  { %710 = vmatprep.subr.bf16.mxu0 %v777_v6  ;;  %754 = vmatprep.subr.bf16.mxu1 %v777_v6 }
  0x2e   :  { %711 = vmatpush3.bf16.msra.mxu0 %v777_v6  ;;  %762 = vmatpush3.bf16.msra.mxu1 %v777_v6 }
  0x2f   :  { %712 = vmatprep.subr.bf16.mxu0 %v778_v7  ;;  %755 = vmatprep.subr.bf16.mxu1 %v778_v7 }
  0x32   :  { %713 = vmatpush3.bf16.msra.mxu0 %v778_v7  ;;  %763 = vmatpush3.bf16.msra.mxu1 %v778_v7 }
  0x33   :  { %714 = vmatprep.subr.bf16.mxu0 %v779_v8  ;;  %756 = vmatprep.subr.bf16.mxu1 %v779_v8 }
  0x36   :  { %715 = vmatpush3.bf16.msra.mxu0 %v779_v8  ;;  %764 = vmatpush3.bf16.msra.mxu1 %v779_v8 }
  0x37   :  { %716 = vmatprep.subr.bf16.mxu0 %v780_v9  ;;  %757 = vmatprep.subr.bf16.mxu1 %v780_v9 }
  0x3a   :  { %717 = vmatpush3.bf16.msra.mxu0 %v780_v9  ;;  %765 = vmatpush3.bf16.msra.mxu1 %v780_v9 }
  0x3d   :  { %719 = vmatmul.mubr.bf16.vlgmr.msra.gmra.mxu0 %v783_v10  ;;  %735 = vmatmul.mubr.bf16.vlgmr.msra.gmra.mxu1 %v784_v11 }
  0x3e   :  { %722 = vmatprep.mubr.bf16.mxu0 %v785_v12  ;;  %738 = vmatprep.mubr.bf16.mxu1 %v786_v13 }
  0x45   :  { %723 = vmatmul.mubr.bf16.gmra.mxu0 %v787_v14  ;;  %739 = vmatmul.mubr.bf16.gmra.mxu1 %v788_v15 }
  0x46   :  { %726 = vmatprep.mubr.bf16.mxu0 %v789_v16  ;;  %742 = vmatprep.mubr.bf16.mxu1 %v790_v17 }
  0x4d   :  { %727 = vmatmul.mubr.bf16.gmra.mxu0 %v791_v18  ;;  %743 = vmatmul.mubr.bf16.gmra.mxu1 %v792_v19 }
  0x4e   :  { %730 = vmatprep.mubr.bf16.mxu0 %v793_v20  ;;  %746 = vmatprep.mubr.bf16.mxu1 %v794_v21 }
  0x55   :  { %731 = vmatmul.mubr.bf16.gmra.mxu0 %v795_v22  ;;  %747 = vmatmul.mubr.bf16.gmra.mxu1 %v796_v23 }
  0xfd   :  { %v720_v25 = vpop.f32.mrf.mxu0  ;;  %v736_v26 = vpop.f32.mrf.mxu1 }
  0xfe   :  { %v573_v27 = vadd.f32 %v720_v25, %v899_v24  ;;  %v589_v28 = vadd.f32 %v736_v26, %v899_v24 }
  0xff   :  { %v338_v29 = vpop.f32.mrf.mxu0  ;;  %v402_v30 = vpop.f32.mrf.mxu1 }
 0x100   :  { %605 = vst [vmem:[#allocation8 + $0x10] sm:$0xff] %v573_v27  ;;  %621 = vst [vmem:[#allocation8 + $0x90] sm:$0xff] %v589_v28  ;;  %v571_v31 = vadd.f32 %v899_v24, %v338_v29  ;;  %v587_v32 = vadd.f32 %v899_v24, %v402_v30 }
 0x101   :  { %v721_v33 = vpop.f32.mrf.mxu0  ;;  %v737_v34 = vpop.f32.mrf.mxu1 }
 0x102   :  { %603 = vst [vmem:[#allocation8] sm:$0xff] %v571_v31  ;;  %619 = vst [vmem:[#allocation8 + $0x80] sm:$0xff] %v587_v32  ;;  %v574_v35 = vadd.f32 %v721_v33, %v899_v24  ;;  %v590_v36 = vadd.f32 %v737_v34, %v899_v24 }
 0x103   :  { %v341_v37 = vpop.f32.mrf.mxu0  ;;  %v405_v38 = vpop.f32.mrf.mxu1 }
 0x104   :  { %606 = vst [vmem:[#allocation8 + $0x18] sm:$0xff] %v574_v35  ;;  %622 = vst [vmem:[#allocation8 + $0x98] sm:$0xff] %v590_v36  ;;  %v572_v39 = vadd.f32 %v899_v24, %v341_v37  ;;  %v588_v40 = vadd.f32 %v899_v24, %v405_v38 }
 0x105   :  { %v724_v41 = vpop.f32.mrf.mxu0  ;;  %v740_v42 = vpop.f32.mrf.mxu1 }
 0x106   :  { %604 = vst [vmem:[#allocation8 + $0x8] sm:$0xff] %v572_v39  ;;  %620 = vst [vmem:[#allocation8 + $0x88] sm:$0xff] %v588_v40  ;;  %v577_v43 = vadd.f32 %v724_v41, %v899_v24  ;;  %v593_v44 = vadd.f32 %v740_v42, %v899_v24 }
 0x107   :  { %v354_v45 = vpop.f32.mrf.mxu0  ;;  %v418_v46 = vpop.f32.mrf.mxu1 }
 0x108   :  { %609 = vst [vmem:[#allocation8 + $0x30] sm:$0xff] %v577_v43  ;;  %625 = vst [vmem:[#allocation8 + $0xb0] sm:$0xff] %v593_v44  ;;  %v575_v47 = vadd.f32 %v899_v24, %v354_v45  ;;  %v591_v48 = vadd.f32 %v899_v24, %v418_v46 }
 0x109   :  { %v725_v49 = vpop.f32.mrf.mxu0  ;;  %v741_v50 = vpop.f32.mrf.mxu1 }
 0x10a   :  { %607 = vst [vmem:[#allocation8 + $0x20] sm:$0xff] %v575_v47  ;;  %623 = vst [vmem:[#allocation8 + $0xa0] sm:$0xff] %v591_v48  ;;  %v578_v51 = vadd.f32 %v725_v49, %v899_v24  ;;  %v594_v52 = vadd.f32 %v741_v50, %v899_v24 }
 0x10b   :  { %v357_v53 = vpop.f32.mrf.mxu0  ;;  %v421_v54 = vpop.f32.mrf.mxu1 }
 0x10c   :  { %610 = vst [vmem:[#allocation8 + $0x38] sm:$0xff] %v578_v51  ;;  %626 = vst [vmem:[#allocation8 + $0xb8] sm:$0xff] %v594_v52  ;;  %v576_v55 = vadd.f32 %v899_v24, %v357_v53  ;;  %v592_v56 = vadd.f32 %v899_v24, %v421_v54 }
 0x10d   :  { %v728_v57 = vpop.f32.mrf.mxu0  ;;  %v744_v58 = vpop.f32.mrf.mxu1 }
 0x10e   :  { %608 = vst [vmem:[#allocation8 + $0x28] sm:$0xff] %v576_v55  ;;  %624 = vst [vmem:[#allocation8 + $0xa8] sm:$0xff] %v592_v56  ;;  %v581_v59 = vadd.f32 %v728_v57, %v899_v24  ;;  %v597_v60 = vadd.f32 %v744_v58, %v899_v24 }
 0x10f   :  { %v370_v61 = vpop.f32.mrf.mxu0  ;;  %v434_v62 = vpop.f32.mrf.mxu1 }
 0x110   :  { %613 = vst [vmem:[#allocation8 + $0x50] sm:$0xff] %v581_v59  ;;  %629 = vst [vmem:[#allocation8 + $0xd0] sm:$0xff] %v597_v60  ;;  %v579_v63 = vadd.f32 %v899_v24, %v370_v61  ;;  %v595_v0 = vadd.f32 %v899_v24, %v434_v62 }
 0x111   :  { %v729_v1 = vpop.f32.mrf.mxu0  ;;  %v745_v2 = vpop.f32.mrf.mxu1 }
 0x112   :  { %611 = vst [vmem:[#allocation8 + $0x40] sm:$0xff] %v579_v63  ;;  %627 = vst [vmem:[#allocation8 + $0xc0] sm:$0xff] %v595_v0  ;;  %v582_v3 = vadd.f32 %v729_v1, %v899_v24  ;;  %v598_v4 = vadd.f32 %v745_v2, %v899_v24 }
 0x113   :  { %v373_v5 = vpop.f32.mrf.mxu0  ;;  %v437_v6 = vpop.f32.mrf.mxu1 }
 0x114   :  { %614 = vst [vmem:[#allocation8 + $0x58] sm:$0xff] %v582_v3  ;;  %630 = vst [vmem:[#allocation8 + $0xd8] sm:$0xff] %v598_v4  ;;  %v580_v7 = vadd.f32 %v899_v24, %v373_v5  ;;  %v596_v8 = vadd.f32 %v899_v24, %v437_v6 }
 0x115   :  { %v732_v9 = vpop.f32.mrf.mxu0  ;;  %v748_v10 = vpop.f32.mrf.mxu1 }
 0x116   :  { %612 = vst [vmem:[#allocation8 + $0x48] sm:$0xff] %v580_v7  ;;  %628 = vst [vmem:[#allocation8 + $0xc8] sm:$0xff] %v596_v8  ;;  %v585_v11 = vadd.f32 %v732_v9, %v899_v24  ;;  %v601_v12 = vadd.f32 %v748_v10, %v899_v24 }
 0x117   :  { %v386_v13 = vpop.f32.mrf.mxu0  ;;  %v450_v14 = vpop.f32.mrf.mxu1 }
 0x118   :  { %617 = vst [vmem:[#allocation8 + $0x70] sm:$0xff] %v585_v11  ;;  %633 = vst [vmem:[#allocation8 + $0xf0] sm:$0xff] %v601_v12  ;;  %v583_v15 = vadd.f32 %v899_v24, %v386_v13  ;;  %v599_v16 = vadd.f32 %v899_v24, %v450_v14 }
 0x119   :  { %v733_v17 = vpop.f32.mrf.mxu0  ;;  %v749_v18 = vpop.f32.mrf.mxu1 }
 0x11a   :  { %615 = vst [vmem:[#allocation8 + $0x60] sm:$0xff] %v583_v15  ;;  %631 = vst [vmem:[#allocation8 + $0xe0] sm:$0xff] %v599_v16  ;;  %v586_v19 = vadd.f32 %v733_v17, %v899_v24  ;;  %v602_v20 = vadd.f32 %v749_v18, %v899_v24 }
 0x11b   :  { %v389_v21 = vpop.f32.mrf.mxu0  ;;  %v453_v22 = vpop.f32.mrf.mxu1 }
 0x11c   :  { %618 = vst [vmem:[#allocation8 + $0x78] sm:$0xff] %v586_v19  ;;  %634 = vst [vmem:[#allocation8 + $0xf8] sm:$0xff] %v602_v20  ;;  %v584_v23 = vadd.f32 %v899_v24, %v389_v21  ;;  %v600_v25 = vadd.f32 %v899_v24, %v453_v22 }
 0x11e   :  { %616 = vst [vmem:[#allocation8 + $0x68] sm:$0xff] %v584_v23  ;;  %632 = vst [vmem:[#allocation8 + $0xe8] sm:$0xff] %v600_v25 }
 0x11f   :  { %848 = shalt.err (!%p845_p0)
}
 0x120   :  { %s868_s26 = smov 128   ;;  %s869_s27 = smov 8  }
 0x121   :  { %646 = dma.vmem_to_hbm [thread:$0]  %s641_s24, 4096, %s939_s3, [#allocation5], %s868_s26, %s868_s26, %s869_s27  }
 0x122   :  { %861 = dma.done.wait [#allocation5], 4096  }
 0x123   :  { %862 = vsyncadd [#allocation5], 4294963200 }
 0x124   :  { %650 = vsyncpa [#allocation4], 1 }
 0x125   :  { %651 = vsyncpa [#allocation7], 1 }
 0x126   :  { %652 = vsyncpa [#allocation5], 1 }

</bundles_post_ra>
